<compile_context>
chip_gen: v7x
topology: tpu7x:2x2x1
jax: 0.10.0
libtpu: 0.0.40
codegen_flags: <defaults>
</compile_context>

<pallas_src>
import functools

import jax
import jax.numpy as jnp
from jax import lax
from jax.experimental import pallas as pl
from jax.experimental.pallas import tpu as pltpu


def _discriminator_kernel(b_ref, v_ref, hpl_ref, hmi_ref, out_ref):
    # b_ref   : SMEM (1,)         bilinear bias (scalar)
    # v_ref   : VMEM (8, n_h)     row 0 = c @ W^T, rows 1..7 zero
    # hpl_ref : VMEM (tm, n_h)    positive-embedding row tile
    # hmi_ref : VMEM (tm, n_h)    negative-embedding row tile
    # out_ref : VMEM (2, tm)      lane-dense scores: row 0 = sc_1, row 1 = sc_2
    b = b_ref[0]
    v = v_ref[...]

    # Contract the feature axis of both operands on the MXU (q @ k^T style):
    #   (8, n_h) x (tm, n_h)^T -> (8, tm); only row 0 is meaningful.
    dn = (((1,), (1,)), ((), ()))
    s1 = lax.dot_general(v, hpl_ref[...], dimension_numbers=dn,
                         preferred_element_type=jnp.float32)
    s2 = lax.dot_general(v, hmi_ref[...], dimension_numbers=dn,
                         preferred_element_type=jnp.float32)

    # Lane-dense stores: each score row is (1, tm) along the lane axis.
    out_ref[0:1, :] = (s1[0:1, :] + b).astype(out_ref.dtype)
    out_ref[1:2, :] = (s2[0:1, :] + b).astype(out_ref.dtype)


@functools.partial(jax.jit, static_argnames=("tm",))
def discriminator_forward(c, h_pl, h_mi, weight, bias,
                          s_bias1=None, s_bias2=None, *, tm=512):
    """c: (1, n_h); h_pl, h_mi: (N, n_h); weight: (n_h, n_h) (= PyTorch weight[0]);
    bias: (1,).  Returns logits (N, 2) in float32."""
    if tm <= 0 or tm % 128 != 0:
        raise ValueError("tm must be a positive multiple of 128")
    N, n_h = h_pl.shape

    dtype = jnp.promote_types(h_pl.dtype, h_mi.dtype)
    itemsize = dtype.itemsize
    h_pl = h_pl.astype(dtype)
    h_mi = h_mi.astype(dtype)

    # Algebraic rewrite: v_row = c @ W^T == (W @ c^T)^T, shape (1, n_h). Computed
    # once in f32; padded to 8 rows (tiny) for clean sublane tiling in the kernel.
    v_row = jnp.dot(c.astype(jnp.float32), weight.astype(jnp.float32).T)
    v = jnp.zeros((8, n_h), dtype).at[0, :].set(v_row[0].astype(dtype))

    # Row tile: shrink if a huge n_h would blow the VMEM budget; use the full
    # extent when N fits in one tile (exact, always legal), otherwise a
    # multiple-of-128 tile with a clipped last grid step.
    tm_eff = tm
    while tm_eff > 128 and 4 * tm_eff * n_h * itemsize > (40 << 20):
        tm_eff //= 2
    if N <= tm_eff:
        tm_eff = N
    grid = (pl.cdiv(N, tm_eff),)

    cost = pl.CostEstimate(
        flops=4 * N * n_h,
        transcendentals=0,
        bytes_accessed=(2 * N * n_h + 8 * n_h) * itemsize + 2 * N * 4,
    )
    # 2 streamed inputs x 2 buffers x tile + v + output + slack, with headroom.
    vmem_est = (4 * tm_eff * n_h * itemsize + 2 * 8 * n_h * itemsize
                + 2 * 2 * tm_eff * 4 + (4 << 20))
    vmem_limit = int(min(max(vmem_est, 16 << 20), 64 << 20))

    out = pl.pallas_call(
        _discriminator_kernel,
        out_shape=jax.ShapeDtypeStruct((2, N), jnp.float32),
        grid_spec=pltpu.PrefetchScalarGridSpec(
            num_scalar_prefetch=0,
            grid=grid,
            in_specs=[
                pl.BlockSpec(memory_space=pltpu.MemorySpace.SMEM),   # bias (1,)
                pl.BlockSpec((8, n_h), lambda i: (0, 0)),            # v
                pl.BlockSpec((tm_eff, n_h), lambda i: (i, 0)),       # h_pl tile
                pl.BlockSpec((tm_eff, n_h), lambda i: (i, 0)),       # h_mi tile
            ],
            out_specs=pl.BlockSpec((2, tm_eff), lambda i: (0, i)),
        ),
        compiler_params=pltpu.CompilerParams(
            dimension_semantics=("parallel",),
            vmem_limit_bytes=vmem_limit,
        ),
        cost_estimate=cost,
    )(bias.astype(jnp.float32).reshape(1), v, h_pl, h_mi)

    logits = out.T                                        # back to PyTorch (N, 2)

    # Optional sample biases from the original forward signature (O(N) adds,
    # applied outside the streaming kernel).
    if s_bias1 is not None:
        logits = logits.at[:, 0:1].add(
            jnp.asarray(s_bias1, jnp.float32).reshape(-1, 1))
    if s_bias2 is not None:
        logits = logits.at[:, 1:2].add(
            jnp.asarray(s_bias2, jnp.float32).reshape(-1, 1))
    return logits


def _xavier_uniform(key, shape):
    # nn.Bilinear weight is (1, n_h, n_h); xavier bound with fan_in=fan_out=n_h.
    n_h = shape[-1]
    bound = (6.0 / (n_h + n_h)) ** 0.5
    return jax.random.uniform(key, shape, jnp.float32, -bound, bound)


def _reference(c, h_pl, h_mi, weight, bias, s_bias1=None, s_bias2=None):
    cx = jnp.broadcast_to(c, h_pl.shape)
    sc1 = jnp.sum((h_pl @ weight) * cx, axis=-1, keepdims=True) + bias[0]
    sc2 = jnp.sum((h_mi @ weight) * cx, axis=-1, keepdims=True) + bias[0]
    if s_bias1 is not None:
        sc1 = sc1 + s_bias1
    if s_bias2 is not None:
        sc2 = sc2 + s_bias2
    return jnp.concatenate([sc1, sc2], axis=1)


if __name__ == "__main__":
    n_h = 32
    key = jax.random.PRNGKey(0)
    k_w, k_c, k_pl, k_mi, k_b1, k_b2 = jax.random.split(key, 6)

    # Parameters (Bilinear(n_h, n_h, 1): weight[0] is (n_h, n_h), bias (1,) = 0).
    weight = _xavier_uniform(k_w, (n_h, n_h))
    bias = jnp.zeros((1,), jnp.float32)
    c = jax.random.normal(k_c, (1, n_h), jnp.float32)

    # Test 1: N=200 (single full-extent row block), no sample biases.
    N1 = 200
    h_pl1 = jax.random.normal(k_pl, (N1, n_h), jnp.float32)
    h_mi1 = jax.random.normal(k_mi, (N1, n_h), jnp.float32)
    logits1 = discriminator_forward(c, h_pl1, h_mi1, weight, bias, tm=512)
    jax.block_until_ready(logits1)
    ref1 = _reference(c, h_pl1, h_mi1, weight, bias)
    assert logits1.shape == (N1, 2)
    assert jnp.allclose(logits1, ref1, atol=1e-4, rtol=1e-4)

    # Test 2: N=300 with tm=128 (multi-step grid, ragged last block) + sample biases.
    N2 = 300
    h_pl2 = jax.random.normal(k_pl, (N2, n_h), jnp.float32)
    h_mi2 = jax.random.normal(k_mi, (N2, n_h), jnp.float32)
    s_b1 = jax.random.normal(k_b1, (N2, 1), jnp.float32)
    s_b2 = jax.random.normal(k_b2, (N2, 1), jnp.float32)
    logits2 = discriminator_forward(c, h_pl2, h_mi2, weight, bias,
                                    s_b1, s_b2, tm=128)
    jax.block_until_ready(logits2)
    ref2 = _reference(c, h_pl2, h_mi2, weight, bias, s_b1, s_b2)
    assert logits2.shape == (N2, 2)
    assert jnp.allclose(logits2, ref2, atol=1e-4, rtol=1e-4)

    print("KERNEL_OK")
</pallas_src>

<mosaic_0001>
module attributes {stable_mosaic.version = 11 : i64} {
  func.func @_discriminator_kernel(%arg0: i32, %arg1: memref<1xf32, #tpu.memory_space<smem>>, %arg2: memref<8x32xf32, #tpu.memory_space<vmem>>, %arg3: memref<200x32xf32, #tpu.memory_space<vmem>>, %arg4: memref<200x32xf32, #tpu.memory_space<vmem>>, %arg5: memref<2x200xf32, #tpu.memory_space<vmem>>) attributes {dimension_semantics = [#tpu.dimension_semantics<parallel>], iteration_bounds = array<i64: 1>, scalar_prefetch = 0 : i64, scratch_operands = 0 : i64, tpu.core_type = #tpu.core_type<tc>, window_params = [{transform_indices = @transform_0, window_bounds = array<i64: 1>}, {pipeline_mode = #tpu.pipeline_mode<synchronous>, transform_indices = @transform_1, window_bounds = array<i64: 8, 32>}, {transform_indices = @transform_2, window_bounds = array<i64: 200, 32>}, {transform_indices = @transform_3, window_bounds = array<i64: 200, 32>}, {transform_indices = @transform_4, window_bounds = array<i64: 2, 200>}]} {
    %c0 = arith.constant 0 : index
    %0 = memref.load %arg1[%c0] : memref<1xf32, #tpu.memory_space<smem>>
    %c0_0 = arith.constant 0 : index
    %c0_1 = arith.constant 0 : index
    %1 = vector.load %arg2[%c0_0, %c0_1] : memref<8x32xf32, #tpu.memory_space<vmem>>, vector<8x32xf32>
    %c0_2 = arith.constant 0 : index
    %c0_3 = arith.constant 0 : index
    %2 = vector.load %arg3[%c0_2, %c0_3] : memref<200x32xf32, #tpu.memory_space<vmem>>, vector<200x32xf32>
    %cst = arith.constant dense<0.000000e+00> : vector<8x200xf32>
    %3 = tpu.matmul %1, %2, %cst {dimension_numbers = #tpu.dot_dimension_numbers<[1], [1], [0], [0], [0, 0, 1, 0], [], []>} : vector<8x32xf32>, vector<200x32xf32>, vector<8x200xf32> -> vector<8x200xf32>
    %c0_4 = arith.constant 0 : index
    %c0_5 = arith.constant 0 : index
    %4 = vector.load %arg4[%c0_4, %c0_5] : memref<200x32xf32, #tpu.memory_space<vmem>>, vector<200x32xf32>
    %cst_6 = arith.constant dense<0.000000e+00> : vector<8x200xf32>
    %5 = tpu.matmul %1, %4, %cst_6 {dimension_numbers = #tpu.dot_dimension_numbers<[1], [1], [0], [0], [0, 0, 1, 0], [], []>} : vector<8x32xf32>, vector<200x32xf32>, vector<8x200xf32> -> vector<8x200xf32>
    %6 = vector.extract_strided_slice %3 {offsets = [0, 0], sizes = [1, 200], strides = [1, 1]} : vector<8x200xf32> to vector<1x200xf32>
    %7 = vector.broadcast %0 : f32 to vector<1x200xf32>
    %8 = arith.addf %6, %7 : vector<1x200xf32>
    %c0_7 = arith.constant 0 : index
    %c0_8 = arith.constant 0 : index
    %9 = vector.load %arg5[%c0_7, %c0_8] : memref<2x200xf32, #tpu.memory_space<vmem>>, vector<1x200xf32>
    tpu.vector_store %arg5[%c0_7, %c0_8], %8 {strides = array<i32>} : memref<2x200xf32, #tpu.memory_space<vmem>>, vector<1x200xf32>,
    %10 = vector.extract_strided_slice %5 {offsets = [0, 0], sizes = [1, 200], strides = [1, 1]} : vector<8x200xf32> to vector<1x200xf32>
    %11 = vector.broadcast %0 : f32 to vector<1x200xf32>
    %12 = arith.addf %10, %11 : vector<1x200xf32>
    %c1 = arith.constant 1 : index
    %c0_9 = arith.constant 0 : index
    %13 = vector.load %arg5[%c1, %c0_9] : memref<2x200xf32, #tpu.memory_space<vmem>>, vector<1x200xf32>
    tpu.vector_store %arg5[%c1, %c0_9], %12 {strides = array<i32>} : memref<2x200xf32, #tpu.memory_space<vmem>>, vector<1x200xf32>,
    return
  }
  func.func @transform_0(%arg0: i32) -> i32 {
    %c0_i32 = arith.constant 0 : i32
    %c0_i32_0 = arith.constant 0 : i32
    return %c0_i32 : i32
  }
  func.func @transform_1(%arg0: i32) -> (i32, i32) {
    %c0_i32 = arith.constant 0 : i32
    %c0_i32_0 = arith.constant 0 : i32
    %c0_i32_1 = arith.constant 0 : i32
    return %c0_i32, %c0_i32_0 : i32, i32
  }
  func.func @transform_2(%arg0: i32) -> (i32, i32) {
    %c0_i32 = arith.constant 0 : i32
    %c0_i32_0 = arith.constant 0 : i32
    return %arg0, %c0_i32 : i32, i32
  }
  func.func @transform_3(%arg0: i32) -> (i32, i32) {
    %c0_i32 = arith.constant 0 : i32
    %c0_i32_0 = arith.constant 0 : i32
    return %arg0, %c0_i32 : i32, i32
  }
  func.func @transform_4(%arg0: i32) -> (i32, i32) {
    %c0_i32 = arith.constant 0 : i32
    %c0_i32_0 = arith.constant 0 : i32
    return %c0_i32, %arg0 : i32, i32
  }
}

</mosaic_0001>

<bundles_post_ra>
// kernel: discriminator_forward.1
= control target key start
LH: loop header
LB: loop body
LE: loop exit
PB: predicated region body
PF: predicated region fallthrough
CT: control target
= control target key end

     0   :  { %vm46_vm0 = vcmask 261120   ;;  %v605_v3 = vmov 0.0|0.0   ;;  %v606_v8 = vmov 0.0   ;;  %s888_s0 = inlined_call_operand.<no memory space> [shape: f32[1], index: 0, kind: input, shape index: {}]   ;;  %s889_s1 = inlined_call_operand.vmem [shape: f32[8,32], index: 1, kind: input, shape index: {}]   ;;  %s890_s2 = inlined_call_operand.vmem [shape: f32[200,32], index: 2, kind: input, shape index: {}]   ;;  %s891_s3 = inlined_call_operand.vmem [shape: f32[200,32], index: 3, kind: input, shape index: {}]   ;;  %s892_s4 = inlined_call_operand.hbm [shape: f32[2,200], index: 4, kind: output, shape index: {}]  }
   0x1   :  { %v21_v0 = vld [vmem:[%s890_s2] sm:$0xff]  ;;  %v22_v1 = vld [vmem:[%s890_s2 + $0x8] sm:$0xff]  ;;  %481 = vmatprep.subr.bf16.mxu0 %v605_v3  ;;  %529 = vmatprep.subr.bf16.mxu1 %v605_v3  ;;  %vm647_vm1 = vmpackc.low %vm46_vm0, %vm46_vm0 }
   0x2   :  { %v196_v2 = vld [vmem:[%s891_s3] sm:$0xff]  ;;  %v482_v4 = vpack.c.bf16 %v22_v1, %v21_v0  ;;  %v197_v6 = vld [vmem:[%s891_s3 + $0x8] sm:$0xff]  ;;  %189 = vmatprep.mubr.f32.mxu0 %v606_v8  ;;  %360 = vmatprep.mubr.f32.mxu1 %v606_v8  ;;  %v23_v9 = vld [vmem:[%s890_s2 + $0x10] sm:$0xff] }
   0x3   :  { %v530_v7 = vpack.c.bf16 %v197_v6, %v196_v2  ;;  %v24_v10 = vld [vmem:[%s890_s2 + $0x18] sm:$0xff]  ;;  %v198_v11 = vld [vmem:[%s891_s3 + $0x10] sm:$0xff]  ;;  %v25_v15 = vld [vmem:[%s890_s2 + $0x20] sm:$0xff] }
   0x4   :  { %484 = vmatpush1.bf16.xpose.msk.msra.mxu0 %vm647_vm1, %v482_v4  ;;  %v199_v12 = vld [vmem:[%s891_s3 + $0x18] sm:$0xff]  ;;  %v486_v13 = vpack.c.bf16 %v24_v10, %v23_v9  ;;  %v26_v16 = vld [vmem:[%s890_s2 + $0x28] sm:$0xff]  ;;  %v200_v17 = vld [vmem:[%s891_s3 + $0x20] sm:$0xff] }
   0x5   :  { %532 = vmatpush1.bf16.xpose.msk.msra.mxu1 %vm647_vm1, %v530_v7  ;;  %485 = vmatprep.subr.bf16.mxu0 %v605_v3  ;;  %v534_v14 = vpack.c.bf16 %v199_v12, %v198_v11  ;;  %v201_v18 = vld [vmem:[%s891_s3 + $0x28] sm:$0xff]  ;;  %v490_v19 = vpack.c.bf16 %v26_v16, %v25_v15 }
   0x6   :  { %533 = vmatprep.subr.bf16.mxu1 %v605_v3  ;;  %v538_v20 = vpack.c.bf16 %v201_v18, %v200_v17 }
   0xc   :  { %488 = vmatpush1.bf16.xpose.msk.msra.mxu0 %vm647_vm1, %v486_v13 }
   0xd   :  { %536 = vmatpush1.bf16.xpose.msk.msra.mxu1 %vm647_vm1, %v534_v14  ;;  %489 = vmatprep.subr.bf16.mxu0 %v605_v3 }
   0xe   :  { %537 = vmatprep.subr.bf16.mxu1 %v605_v3 }
   0xf   :  { %10 = vsyncpa [#allocation4], 0  ;;  %v27_v21 = vld [vmem:[%s890_s2 + $0x30] sm:$0xff]  ;;  %v28_v22 = vld [vmem:[%s890_s2 + $0x38] sm:$0xff]  ;;  %v607_v5 = vmov 1966171168   ;;  %v376_v16 = vlaneseq  ;;  %v367_v17 = vstv %s888_s0 }
  0x10   :  { %v202_v23 = vld [vmem:[%s891_s3 + $0x30] sm:$0xff]  ;;  %v203_v24 = vld [vmem:[%s891_s3 + $0x38] sm:$0xff]  ;;  %v494_v25 = vpack.c.bf16 %v28_v22, %v27_v21  ;;  %v29_v27 = vld [vmem:[%s890_s2 + $0x40] sm:$0xff] }
  0x11   :  { %v542_v26 = vpack.c.bf16 %v203_v24, %v202_v23  ;;  %v30_v28 = vld [vmem:[%s890_s2 + $0x48] sm:$0xff]  ;;  %v204_v29 = vld [vmem:[%s891_s3 + $0x40] sm:$0xff]  ;;  %v31_v33 = vld [vmem:[%s890_s2 + $0x50] sm:$0xff]  ;;  %vm390_vm2 = vcmp.lt.s32.totalorder %v376_v16, 200 }
  0x12   :  { %v205_v30 = vld [vmem:[%s891_s3 + $0x48] sm:$0xff]  ;;  %v498_v31 = vpack.c.bf16 %v30_v28, %v29_v27  ;;  %v32_v34 = vld [vmem:[%s890_s2 + $0x58] sm:$0xff]  ;;  %v206_v35 = vld [vmem:[%s891_s3 + $0x50] sm:$0xff] }
  0x13   :  { %v546_v32 = vpack.c.bf16 %v205_v30, %v204_v29  ;;  %v207_v36 = vld [vmem:[%s891_s3 + $0x58] sm:$0xff]  ;;  %v502_v37 = vpack.c.bf16 %v32_v34, %v31_v33  ;;  %v33_v39 = vld [vmem:[%s890_s2 + $0x60] sm:$0xff]  ;;  %v34_v40 = vld [vmem:[%s890_s2 + $0x68] sm:$0xff] }
  0x14   :  { %492 = vmatpush1.bf16.xpose.msk.msra.mxu0 %vm647_vm1, %v490_v19  ;;  %v550_v38 = vpack.c.bf16 %v207_v36, %v206_v35  ;;  %v208_v41 = vld [vmem:[%s891_s3 + $0x60] sm:$0xff]  ;;  %v209_v42 = vld [vmem:[%s891_s3 + $0x68] sm:$0xff]  ;;  %v506_v43 = vpack.c.bf16 %v34_v40, %v33_v39  ;;  %v35_v45 = vld [vmem:[%s890_s2 + $0x70] sm:$0xff]  ;;  %v377_v19 = vshrl.u32 %v376_v16, 7 }
  0x15   :  { %540 = vmatpush1.bf16.xpose.msk.msra.mxu1 %vm647_vm1, %v538_v20  ;;  %493 = vmatprep.subr.bf16.mxu0 %v605_v3  ;;  %v554_v44 = vpack.c.bf16 %v209_v42, %v208_v41  ;;  %v36_v46 = vld [vmem:[%s890_s2 + $0x78] sm:$0xff]  ;;  %v210_v47 = vld [vmem:[%s891_s3 + $0x70] sm:$0xff]  ;;  %v37_v51 = vld [vmem:[%s890_s2 + $0x80] sm:$0xff] }
  0x16   :  { %541 = vmatprep.subr.bf16.mxu1 %v605_v3  ;;  %v211_v48 = vld [vmem:[%s891_s3 + $0x78] sm:$0xff]  ;;  %v510_v49 = vpack.c.bf16 %v36_v46, %v35_v45  ;;  %v38_v52 = vld [vmem:[%s890_s2 + $0x88] sm:$0xff]  ;;  %v212_v53 = vld [vmem:[%s891_s3 + $0x80] sm:$0xff] }
  0x17   :  { %v558_v50 = vpack.c.bf16 %v211_v48, %v210_v47  ;;  %v213_v54 = vld [vmem:[%s891_s3 + $0x88] sm:$0xff]  ;;  %v514_v55 = vpack.c.bf16 %v38_v52, %v37_v51  ;;  %v39_v57 = vld [vmem:[%s890_s2 + $0x90] sm:$0xff]  ;;  %v40_v58 = vld [vmem:[%s890_s2 + $0x98] sm:$0xff] }
  0x18   :  { %v562_v56 = vpack.c.bf16 %v213_v54, %v212_v53  ;;  %v214_v59 = vld [vmem:[%s891_s3 + $0x90] sm:$0xff]  ;;  %v215_v60 = vld [vmem:[%s891_s3 + $0x98] sm:$0xff]  ;;  %v518_v61 = vpack.c.bf16 %v40_v58, %v39_v57  ;;  %v41_v63 = vld [vmem:[%s890_s2 + $0xa0] sm:$0xff] }
  0x19   :  { %v566_v62 = vpack.c.bf16 %v215_v60, %v214_v59  ;;  %v42_v0 = vld [vmem:[%s890_s2 + $0xa8] sm:$0xff]  ;;  %v216_v1 = vld [vmem:[%s891_s3 + $0xa0] sm:$0xff]  ;;  %v43_v7 = vld [vmem:[%s890_s2 + $0xb0] sm:$0xff] }
  0x1a   :  { %v217_v2 = vld [vmem:[%s891_s3 + $0xa8] sm:$0xff]  ;;  %v522_v4 = vpack.c.bf16 %v42_v0, %v41_v63  ;;  %v44_v9 = vld [vmem:[%s890_s2 + $0xb8] sm:$0xff]  ;;  %v218_v10 = vld [vmem:[%s891_s3 + $0xb0] sm:$0xff] }
  0x1b   :  { %v570_v6 = vpack.c.bf16 %v217_v2, %v216_v1  ;;  %v219_v11 = vld [vmem:[%s891_s3 + $0xb8] sm:$0xff]  ;;  %v526_v12 = vpack.c.bf16 %v44_v9, %v43_v7  ;;  %v220_v14 = vld [vmem:[%s891_s3 + $0xc0] sm:$0xff] }
  0x1c   :  { %496 = vmatpush1.bf16.xpose.msk.msra.mxu0 %vm647_vm1, %v494_v25  ;;  %v574_v13 = vpack.c.bf16 %v219_v11, %v218_v10  ;;  %v20_v15 = vld [vmem:[%s889_s1] sm:$0xff]  ;;  %s608_s1 = smov [#allocation3]  }
  0x1d   :  { %544 = vmatpush1.bf16.xpose.msk.msra.mxu1 %vm647_vm1, %v542_v26  ;;  %497 = vmatprep.subr.bf16.mxu0 %v605_v3  ;;  %s421_s3 = sshll.u32 %s608_s1, 4  ;;  %s422_s3 = int_to_ptr.vmem [resolvable:$true] %s421_s3 }
  0x1e   :  { %545 = vmatprep.subr.bf16.mxu1 %v605_v3  ;;  %s581_s0 = scalar_lea.vmem %s422_s3, 64  ;;  %p586_p1 = scmp.lt.s32.totalorder %s422_s3, %s422_s3 }
  0x1f   :  { %p582_p0 = scmp.ne.s32.totalorder %s422_s3, %s581_s0  ;;  %p587_p2 = scmp.lt.s32.totalorder %s581_s0, %s581_s0 }
  0x21   :  { %p588_p3 = por %p587_p2, %p586_p1 }
  0x23   :  { %p589_p4 = pnand %p588_p3, %p582_p0 }
  0x24   :  { %500 = vmatpush1.bf16.xpose.msk.msra.mxu0 %vm647_vm1, %v498_v31 }
  0x25   :  { %548 = vmatpush1.bf16.xpose.msk.msra.mxu1 %vm647_vm1, %v546_v32  ;;  %501 = vmatprep.subr.bf16.mxu0 %v605_v3 }
  0x26   :  { %549 = vmatprep.subr.bf16.mxu1 %v605_v3 }
  0x2c   :  { %504 = vmatpush1.bf16.xpose.msk.msra.mxu0 %vm647_vm1, %v502_v37 }
  0x2d   :  { %552 = vmatpush1.bf16.xpose.msk.msra.mxu1 %vm647_vm1, %v550_v38  ;;  %505 = vmatprep.subr.bf16.mxu0 %v605_v3 }
  0x2e   :  { %553 = vmatprep.subr.bf16.mxu1 %v605_v3 }
  0x34   :  { %508 = vmatpush1.bf16.xpose.msk.msra.mxu0 %vm647_vm1, %v506_v43 }
  0x35   :  { %556 = vmatpush1.bf16.xpose.msk.msra.mxu1 %vm647_vm1, %v554_v44  ;;  %509 = vmatprep.subr.bf16.mxu0 %v605_v3 }
  0x36   :  { %557 = vmatprep.subr.bf16.mxu1 %v605_v3 }
  0x3c   :  { %512 = vmatpush1.bf16.xpose.msk.msra.mxu0 %vm647_vm1, %v510_v49 }
  0x3d   :  { %560 = vmatpush1.bf16.xpose.msk.msra.mxu1 %vm647_vm1, %v558_v50  ;;  %513 = vmatprep.subr.bf16.mxu0 %v605_v3 }
  0x3e   :  { %561 = vmatprep.subr.bf16.mxu1 %v605_v3 }
  0x44   :  { %516 = vmatpush1.bf16.xpose.msk.msra.mxu0 %vm647_vm1, %v514_v55 }
  0x45   :  { %564 = vmatpush1.bf16.xpose.msk.msra.mxu1 %vm647_vm1, %v562_v56  ;;  %517 = vmatprep.subr.bf16.mxu0 %v605_v3 }
  0x46   :  { %565 = vmatprep.subr.bf16.mxu1 %v605_v3 }
  0x4c   :  { %520 = vmatpush1.bf16.xpose.msk.msra.mxu0 %vm647_vm1, %v518_v61 }
  0x4d   :  { %568 = vmatpush1.bf16.xpose.msk.msra.mxu1 %vm647_vm1, %v566_v62  ;;  %521 = vmatprep.subr.bf16.mxu0 %v605_v3 }
  0x4e   :  { %569 = vmatprep.subr.bf16.mxu1 %v605_v3 }
  0x54   :  { %524 = vmatpush1.bf16.xpose.msk.msra.mxu0 %vm647_vm1, %v522_v4 }
  0x55   :  { %572 = vmatpush1.bf16.xpose.msk.msra.mxu1 %vm647_vm1, %v570_v6  ;;  %525 = vmatprep.subr.bf16.mxu0 %v605_v3 }
  0x56   :  { %573 = vmatprep.subr.bf16.mxu1 %v605_v3  ;;  %v45_v3 = vld [vmem:[%s890_s2 + $0xc0] sm:$0xff] }
  0x5c   :  { %528 = vmatpush1.bf16.xpose.msk.msra.mxu0 %vm647_vm1, %v526_v12 }
  0x5d   :  { %576 = vmatpush1.bf16.xpose.msk.msra.mxu1 %vm647_vm1, %v574_v13  ;;  %173 = vmatprep.subr.mxu0 %v606_v8 }
  0x5e   :  { %344 = vmatprep.subr.mxu1 %v606_v8  ;;  %v374_v8 = vunpack.c.l.s4 %v607_v5 }
  0x60   :  { %v375_v18 = vunpack.c.0.s8 %v374_v8 }
  0x62   :  { %v378_v26 = vsub.s32 %v375_v18, %v377_v19 }
  0x64   :  { %453 = vmatpush1.xpose.msk.msra.mxu0 %vm46_vm0, %v45_v3 }
  0x65   :  { %479 = vmatpush1.xpose.msk.msra.mxu1 %vm46_vm0, %v220_v14 }
  0x67   :  { %454 = vmatmul.mubr.msk.f32.vlgmr.msra.gmra.mrb[0].mxu0 %vm46_vm0, %v20_v15 }
  0x68   :  { %480 = vmatmul.mubr.msk.f32.vlgmr.msra.gmra.mrb[0].mxu1 %vm46_vm0, %v20_v15 }
 0x13a   :  { %v191_v20 = vpop.f32.mrb[0].mxu0 }
 0x13b   :  { %v368_v21 = vadd.f32 %v367_v17, %v191_v20  ;;  %v362_v22 = vpop.f32.mrb[0].mxu1  ;;  %v193_v23 = vpop.f32.mrb[1].mxu0 }
 0x13c   :  { %v393_v24 = vadd.f32 %v367_v17, %v362_v22  ;;  %v369_v25 = vadd.f32 %v367_v17, %v193_v23  ;;  %v364_v27 = vpop.f32.mrb[1].mxu1 }
 0x13d   :  { %v394_v28 = vadd.f32 %v367_v17, %v364_v27 }
 0x13e   :  { %v372_v29 = vcombine.low %v368_v21, %v369_v25 }
 0x13f   :  { %v397_v30 = vcombine.low %v393_v24, %v394_v28 }
 0x140   :  { %v379_v31 = vrot.slane %v372_v29, %v378_v26 }
 0x141   :  { %v404_v32 = vrot.slane %v397_v30, %v378_v26 }
 0x142   :  { %v386_v33 = vrot.slane %v379_v31, %v378_v26 }
 0x143   :  { %v411_v34 = vrot.slane %v404_v32, %v378_v26 }
 0x144   :  { %392 = vst.msk [vmem:[#allocation3] ss:$2 sm:$0x3] %vm390_vm2, %v386_v33 }
 0x145   :  { %414 = vst.msk [vmem:[#allocation3 + $0x1] ss:$2 sm:$0x3] %vm390_vm2, %v411_v34 }
 0x146   :  { %592 = shalt.err (!%p589_p4)
}
 0x147   :  { %s593_s16 = scalar_lea.hbm %s892_s4, 64 }
 0x148   :  { %p594_p5 = scmp.ne.s32.totalorder %s892_s4, %s593_s16  ;;  %p597_p6 = scmp.lt.u32.totalorder %s593_s16, %s892_s4 }
 0x14a   :  { %p599_p7 = pnand %p597_p6, %p594_p5 }
 0x14c   :  { %602 = shalt.err (!%p599_p7)
}
 0x14d   :  { %424 = dma.vmem_to_hbm [thread:$0]  %s422_s3, 64, %s892_s4, [#allocation4]  }
 0x14e   :  { %603 = dma.done.wait [#allocation4], 64  }
 0x14f   :  { %604 = vsyncadd [#allocation4], 4294967232 }
 0x150   :  { %428 = vsyncpa [#allocation4], 1 }

</bundles_post_ra>
